<compile_context>
chip_gen: v6e
topology: v6e:2x2x1
jax: 0.10.0
libtpu: 0.0.40
codegen_flags: <defaults>
</compile_context>

<pallas_src>
import functools

import jax
import jax.numpy as jnp
from jax.experimental import pallas as pl
from jax.experimental.pallas import tpu as pltpu


def _round_up(x, m):
    return (x + m - 1) // m * m


def _linear_silu_whole_k_kernel(x_ref, w_ref, b_ref, o_ref):
    # x_ref: (tm, Kp), w_ref: (Kp, tn), b_ref: (1, tn), o_ref: (tm, tn)
    y = jnp.dot(x_ref[...], w_ref[...], preferred_element_type=jnp.float32)
    y = y + b_ref[...].astype(jnp.float32)
    o_ref[...] = (y * jax.nn.sigmoid(y)).astype(o_ref.dtype)


def _linear_silu_ktiled_kernel(x_ref, w_ref, b_ref, o_ref, acc_ref):
    # x_ref: (tm, tk), w_ref: (tk, tn), b_ref: (1, tn), o_ref/acc_ref: (tm, tn)
    k = pl.program_id(2)

    @pl.when(k == 0)
    def _():
        acc_ref[...] = jnp.zeros_like(acc_ref)

    acc_ref[...] += jnp.dot(x_ref[...], w_ref[...],
                            preferred_element_type=jnp.float32)

    @pl.when(k == pl.num_programs(2) - 1)
    def _():
        y = acc_ref[...] + b_ref[...].astype(jnp.float32)
        # SiLU / swish epilogue in f32, single downcast on the final K step.
        o_ref[...] = (y * jax.nn.sigmoid(y)).astype(o_ref.dtype)


def linear_activation(hidden_states, weight, bias=None, *,
                      tm=None, tn=None, tk=None, compute_dtype="auto"):
    """Fused Linear + SiLU (PyTorch LinearActivation forward).

    hidden_states: (..., dim_in)
    weight:        (dim_out, dim_in)  -- PyTorch nn.Linear layout
    bias:          (dim_out,) or None
    compute_dtype: "auto" (bf16 for f32 inputs), an explicit dtype, or None
                   (keep input dtype). Accumulation and epilogue are always f32.
    returns:       (..., dim_out)
    """
    orig_shape = hidden_states.shape
    dim_in = orig_shape[-1]
    dim_out, dim_in_w = weight.shape
    assert dim_in_w == dim_in, "weight/in-feature mismatch"

    out_dtype = hidden_states.dtype
    x2d = hidden_states.reshape(-1, dim_in)

    if compute_dtype == "auto":
        cdtype = jnp.bfloat16 if x2d.dtype == jnp.float32 else x2d.dtype
    elif compute_dtype is None:
        cdtype = x2d.dtype
    else:
        cdtype = jnp.dtype(compute_dtype)

    x2d = x2d.astype(cdtype)
    # One-time HBM transpose to (K, N): the kernel contraction then maps onto a
    # transposed-RHS-free MXU matmul (no per-tile XLU transpose of the weight).
    w_t = weight.astype(cdtype).T

    if bias is None:
        bias = jnp.zeros((dim_out,), dtype=jnp.float32)
    b2d = bias.astype(jnp.float32).reshape(1, dim_out)

    M, K, N = x2d.shape[0], dim_in, dim_out

    # ---- generation-aware VMEM budget -------------------------------------
    try:
        info = pltpu.get_tpu_info()
        vmem_cap = int(getattr(info, "vmem_capacity_bytes", 64 * 1024 * 1024))
    except Exception:
        vmem_cap = 64 * 1024 * 1024  # conservative: v7x per-TensorCore VMEM
    vmem_budget = int(vmem_cap * 0.7)

    bpe_c = jnp.dtype(cdtype).itemsize
    bpe_o = jnp.dtype(out_dtype).itemsize

    # ---- tile selection -----------------------------------------------------
    K128 = _round_up(K, 128)
    tm = _round_up(min(tm if tm is not None else 512, _round_up(M, 8)), 8)
    tn = _round_up(min(tn if tn is not None else 512, _round_up(N, 128)), 128)

    # v7x has 2 TensorCores: if M collapses to a single block, split N so the
    # parallel sub-grid has >= 2 blocks (when N allows).
    if _round_up(M, tm) // tm == 1:
        while tn > 128 and _round_up(N, tn) // tn < 2:
            tn = max(128, (tn // 2) // 128 * 128)

    def _vmem_needed(tk_, with_acc):
        # double-buffered x/w/out tiles + bias block (+ f32 accumulator)
        need = 2 * (tm * tk_ * bpe_c + tk_ * tn * bpe_c + tm * tn * bpe_o) \
            + 2 * tn * 4
        if with_acc:
            need += tm * tn * 4
        return need

    if tk is not None:
        tk = _round_up(min(tk, K128), 128)
        whole_k = tk >= K128
        if whole_k:
            tk = K128
    else:
        if _vmem_needed(K128, with_acc=False) <= vmem_budget:
            tk, whole_k = K128, True
        else:
            whole_k = False
            tk = min(2048, K128)
            while tk > 128 and _vmem_needed(tk, True) > vmem_budget:
                tk = max(128, (tk // 2) // 128 * 128)
            while tm > 8 and _vmem_needed(tk, True) > vmem_budget:
                tm = max(8, _round_up(tm // 2, 8))

    Mp, Np, Kp = _round_up(M, tm), _round_up(N, tn), _round_up(K, tk)

    # ---- zero-pad to tile multiples (padded K contributes zero to the dot) --
    if (Mp, Kp) != (M, K):
        x2d = jnp.pad(x2d, ((0, Mp - M), (0, Kp - K)))
    if (Kp, Np) != (K, N):
        w_t = jnp.pad(w_t, ((0, Kp - K), (0, Np - N)))
    if Np != N:
        b2d = jnp.pad(b2d, ((0, 0), (0, Np - N)))

    grid_m, grid_n = Mp // tm, Np // tn

    needed = _vmem_needed(tk, with_acc=not whole_k)
    vmem_limit = int(min(max(needed * 2, 16 * 1024 * 1024), vmem_budget))

    cost = pl.CostEstimate(
        flops=2 * M * K * N,
        transcendentals=M * N,
        bytes_accessed=(grid_n * M * K * bpe_c      # x re-read once per N block
                        + grid_m * K * N * bpe_c    # w re-read once per M block
                        + M * N * bpe_o             # output written once
                        + grid_m * N * 4),          # bias re-read once per M block
    )

    if whole_k:
        grid = (grid_m, grid_n)
        in_specs = [
            pl.BlockSpec((tm, Kp), lambda i, j: (i, 0)),   # x tile (full K)
            pl.BlockSpec((Kp, tn), lambda i, j: (0, j)),   # weight tile (K, N)
            pl.BlockSpec((1, tn), lambda i, j: (0, j)),    # bias (only changes with j)
        ]
        out_specs = pl.BlockSpec((tm, tn), lambda i, j: (i, j))
        scratch_shapes = []
        kernel = _linear_silu_whole_k_kernel
        dim_sem = ("parallel", "parallel")
    else:
        grid = (grid_m, grid_n, Kp // tk)
        in_specs = [
            pl.BlockSpec((tm, tk), lambda i, j, k: (i, k)),  # x tile
            pl.BlockSpec((tk, tn), lambda i, j, k: (k, j)),  # weight tile (K, N)
            pl.BlockSpec((1, tn), lambda i, j, k: (0, j)),   # bias (only changes with j)
        ]
        out_specs = pl.BlockSpec((tm, tn), lambda i, j, k: (i, j))
        scratch_shapes = [pltpu.VMEM((tm, tn), jnp.float32)]
        kernel = _linear_silu_ktiled_kernel
        dim_sem = ("parallel", "parallel", "arbitrary")

    out = pl.pallas_call(
        kernel,
        out_shape=jax.ShapeDtypeStruct((Mp, Np), out_dtype),
        grid_spec=pltpu.PrefetchScalarGridSpec(
            num_scalar_prefetch=0,
            grid=grid,
            in_specs=in_specs,
            out_specs=out_specs,
            scratch_shapes=scratch_shapes,
        ),
        compiler_params=pltpu.CompilerParams(
            dimension_semantics=dim_sem,
            vmem_limit_bytes=vmem_limit,
        ),
        cost_estimate=cost,
    )(x2d, w_t, b2d)

    out = out[:M, :N]
    return out.reshape(*orig_shape[:-1], dim_out)


def _reference(x, weight, bias):
    y = x @ weight.T + bias
    return y * jax.nn.sigmoid(y)


if __name__ == "__main__":
    key = jax.random.PRNGKey(0)

    # --- small shape consistent with the module: batch=2, seq=8, dim_in=32, dim_out=64
    batch, seq, dim_in, dim_out = 2, 8, 32, 64
    kx, kw, kb, key = jax.random.split(key, 4)
    x = jax.random.normal(kx, (batch, seq, dim_in), dtype=jnp.float32)
    bound = 1.0 / (dim_in ** 0.5)
    weight = jax.random.uniform(kw, (dim_out, dim_in), minval=-bound, maxval=bound,
                                dtype=jnp.float32)
    bias = jax.random.uniform(kb, (dim_out,), minval=-bound, maxval=bound,
                              dtype=jnp.float32)

    ref = _reference(x, weight, bias)

    # f32 compute path (tight tolerance, exercises whole-K kernel)
    out_f32 = jax.block_until_ready(
        linear_activation(x, weight, bias, compute_dtype=jnp.float32))
    assert out_f32.shape == (batch, seq, dim_out)
    assert jnp.allclose(out_f32, ref, atol=1e-4, rtol=1e-4), "mismatch (f32 small)"

    # default path: bf16 MXU operands, f32 accumulation + epilogue
    out = jax.block_until_ready(linear_activation(x, weight, bias))
    assert out.shape == (batch, seq, dim_out)
    assert jnp.allclose(out, ref, atol=3e-2, rtol=3e-2), "mismatch (bf16 small)"

    # --- larger, non-aligned shape exercising the K-tiled accumulator path ---
    batch2, seq2, din2, dout2 = 2, 200, 384, 512
    kx2, kw2, kb2, key = jax.random.split(key, 4)
    x2 = jax.random.normal(kx2, (batch2, seq2, din2), dtype=jnp.float32)
    bound2 = 1.0 / (din2 ** 0.5)
    w2 = jax.random.uniform(kw2, (dout2, din2), minval=-bound2, maxval=bound2,
                            dtype=jnp.float32)
    b2 = jax.random.uniform(kb2, (dout2,), minval=-bound2, maxval=bound2,
                            dtype=jnp.float32)
    ref2 = _reference(x2, w2, b2)

    # forced small tiles -> multi-tile (M, N, K) grid with f32 accumulator
    out2 = jax.block_until_ready(
        linear_activation(x2, w2, b2, tm=128, tn=256, tk=128))
    assert out2.shape == (batch2, seq2, dout2)
    assert jnp.allclose(out2, ref2, atol=3e-2, rtol=3e-2), "mismatch (bf16 k-tiled)"

    # auto-tiled default path (whole-K, N split for the 2-TC parallel grid)
    out3 = jax.block_until_ready(linear_activation(x2, w2, b2))
    assert jnp.allclose(out3, ref2, atol=3e-2, rtol=3e-2), "mismatch (bf16 auto)"

    print("KERNEL_OK")
</pallas_src>

<mosaic_0001>
module attributes {stable_mosaic.version = 11 : i64} {
  func.func @_linear_silu_whole_k_kernel(%arg0: i32, %arg1: i32, %arg2: memref<16x128xf32, #tpu.memory_space<vmem>>, %arg3: memref<128x128xf32, #tpu.memory_space<vmem>>, %arg4: memref<1x128xf32, #tpu.memory_space<vmem>>, %arg5: memref<16x128xf32, #tpu.memory_space<vmem>>) attributes {dimension_semantics = [#tpu.dimension_semantics<parallel>, #tpu.dimension_semantics<parallel>], iteration_bounds = array<i64: 1, 1>, scalar_prefetch = 0 : i64, scratch_operands = 0 : i64, tpu.core_type = #tpu.core_type<tc>, window_params = [{transform_indices = @transform_0, window_bounds = array<i64: 16, 128>}, {transform_indices = @transform_1, window_bounds = array<i64: 128, 128>}, {transform_indices = @transform_2, window_bounds = array<i64: 1, 128>}, {transform_indices = @transform_3, window_bounds = array<i64: 16, 128>}]} {
    %c0 = arith.constant 0 : index
    %c0_0 = arith.constant 0 : index
    %0 = vector.load %arg2[%c0, %c0_0] : memref<16x128xf32, #tpu.memory_space<vmem>>, vector<16x128xf32>
    %c0_1 = arith.constant 0 : index
    %c0_2 = arith.constant 0 : index
    %1 = vector.load %arg3[%c0_1, %c0_2] : memref<128x128xf32, #tpu.memory_space<vmem>>, vector<128x128xf32>
    %cst = arith.constant dense<0.000000e+00> : vector<16x128xf32>
    %2 = tpu.matmul %0, %1, %cst {dimension_numbers = #tpu.dot_dimension_numbers<[1], [0], [0], [1], [0, 0, 1, 1], [], []>} : vector<16x128xf32>, vector<128x128xf32>, vector<16x128xf32> -> vector<16x128xf32>
    %c0_3 = arith.constant 0 : index
    %c0_4 = arith.constant 0 : index
    %3 = vector.load %arg4[%c0_3, %c0_4] : memref<1x128xf32, #tpu.memory_space<vmem>>, vector<1x128xf32>
    %4 = vector.broadcast %3 : vector<1x128xf32> to vector<16x128xf32>
    %5 = arith.addf %2, %4 : vector<16x128xf32>
    %6 = arith.negf %5 : vector<16x128xf32>
    %7 = math.exp %6 : vector<16x128xf32>
    %cst_5 = arith.constant 1.000000e+00 : f32
    %8 = vector.broadcast %cst_5 : f32 to vector<16x128xf32>
    %9 = arith.addf %8, %7 : vector<16x128xf32>
    %10 = arith.divf %8, %9 : vector<16x128xf32>
    %11 = arith.mulf %5, %10 : vector<16x128xf32>
    %c0_6 = arith.constant 0 : index
    %c0_7 = arith.constant 0 : index
    %12 = vector.load %arg5[%c0_6, %c0_7] : memref<16x128xf32, #tpu.memory_space<vmem>>, vector<16x128xf32>
    tpu.vector_store %arg5[%c0_6, %c0_7], %11 {strides = array<i32>} : memref<16x128xf32, #tpu.memory_space<vmem>>, vector<16x128xf32>,
    return
  }
  func.func @transform_0(%arg0: i32, %arg1: i32) -> (i32, i32) {
    %c0_i32 = arith.constant 0 : i32
    %c0_i32_0 = arith.constant 0 : i32
    return %arg0, %c0_i32 : i32, i32
  }
  func.func @transform_1(%arg0: i32, %arg1: i32) -> (i32, i32) {
    %c0_i32 = arith.constant 0 : i32
    %c0_i32_0 = arith.constant 0 : i32
    return %c0_i32, %arg1 : i32, i32
  }
  func.func @transform_2(%arg0: i32, %arg1: i32) -> (i32, i32) {
    %c0_i32 = arith.constant 0 : i32
    %c0_i32_0 = arith.constant 0 : i32
    return %c0_i32, %arg1 : i32, i32
  }
  func.func @transform_3(%arg0: i32, %arg1: i32) -> (i32, i32) {
    %c0_i32 = arith.constant 0 : i32
    return %arg0, %arg1 : i32, i32
  }
}

</mosaic_0001>

<bundles_post_ra>
// kernel: tpu_custom_call.1
= control target key start
LH: loop header
LB: loop body
LE: loop exit
PB: predicated region body
PF: predicated region fallthrough
CT: control target
= control target key end

     0   :  { %8 = vsyncpa [#allocation3], 0  ;;  %s358_s0 = inlined_call_operand.hbm [shape: f32[16,128], index: 0, kind: input, shape index: {}]   ;;  %s359_s1 = inlined_call_operand.hbm [shape: f32[128,128], index: 1, kind: input, shape index: {}]   ;;  %s360_s2 = inlined_call_operand.vmem [shape: f32[1,128], index: 2, kind: input, shape index: {}]   ;;  %s361_s3 = inlined_call_operand.hbm [shape: f32[16,128], index: 3, kind: output, shape index: {}]  }
   0x1   :  { %9 = vsyncpa [#allocation6], 0 }
   0x2   :  { %10 = vsyncpa [#allocation4], 0  ;;  %s312_s12 = smov [#allocation2]  }
   0x3   :  { %s16_s13 = sshll.u32 %s312_s12, 4  ;;  %s17_s13 = int_to_ptr.vmem [resolvable:$true] %s16_s13 }
   0x4   :  { %s254_s14 = scalar_lea.vmem %s17_s13, 256  ;;  %p259_p1 = scmp.lt.s32.totalorder %s17_s13, %s17_s13 }
   0x5   :  { %p255_p0 = scmp.ne.s32.totalorder %s17_s13, %s254_s14  ;;  %p260_p2 = scmp.lt.s32.totalorder %s254_s14, %s254_s14 }
   0x7   :  { %p261_p3 = por %p260_p2, %p259_p1 }
   0x9   :  { %p262_p4 = pnand %p261_p3, %p255_p0 }
   0xb   :  { %265 = shalt.err (!%p262_p4)
}
   0xc   :  { %s313_s15 = smov 128   ;;  %s314_s16 = smov 8  }
   0xd   :  { %22 = dma.hbm_to_vmem [thread:$0]  %s358_s0, 256, %s17_s13, [#allocation3], %s313_s15, %s313_s15, %s314_s16  }
   0xe   :  { %s315_s19 = smov [#allocation5]  }
   0xf   :  { %s28_s20 = sshll.u32 %s315_s19, 4  ;;  %s29_s20 = int_to_ptr.vmem [resolvable:$true] %s28_s20 }
  0x10   :  { %s274_s21 = scalar_lea.vmem %s29_s20, 2048  ;;  %p279_p6 = scmp.lt.s32.totalorder %s29_s20, %s29_s20 }
  0x11   :  { %p275_p5 = scmp.ne.s32.totalorder %s29_s20, %s274_s21  ;;  %p280_p7 = scmp.lt.s32.totalorder %s274_s21, %s274_s21 }
  0x13   :  { %p281_p8 = por %p280_p7, %p279_p6 }
  0x15   :  { %p282_p9 = pnand %p281_p8, %p275_p5 }
  0x17   :  { %285 = shalt.err (!%p282_p9)
}
  0x18   :  { %34 = dma.hbm_to_vmem [thread:$0]  %s359_s1, 2048, %s29_s20, [#allocation6], %s313_s15, %s313_s15, %s314_s16  }
  0x19   :  { %306 = dma.done.wait [#allocation3], 256  }
  0x1a   :  { %307 = vsyncadd [#allocation3], 4294967040 }
  0x1b   :  { %308 = dma.done.wait [#allocation6], 2048  }
  0x1c   :  { %309 = vsyncadd [#allocation6], 4294965248  ;;  %v60_v0 = vld [vmem:[#allocation5 + $0x78] sm:$0xff]  ;;  %v59_v1 = vld [vmem:[#allocation5 + $0x70] sm:$0xff]  ;;  %s316_s24 = smov [#allocation7]  }
  0x1d   :  { %198 = vmatprep.subr.mxu0 %v60_v0  ;;  %v58_v2 = vld [vmem:[#allocation5 + $0x68] sm:$0xff]  ;;  %v57_v3 = vld [vmem:[#allocation5 + $0x60] sm:$0xff]  ;;  %v43_v4 = vld [vmem:[#allocation2] sm:$0xff]  ;;  %s164_s25 = sshll.u32 %s316_s24, 4  ;;  %s165_s25 = int_to_ptr.vmem [resolvable:$true] %s164_s25 }
  0x1e   :  { %199 = vmatpush3.msra.mxu0 %v60_v0  ;;  %v56_v5 = vld [vmem:[#allocation5 + $0x58] sm:$0xff]  ;;  %230 = vmatprep.mubr.f32.mxu0 %v43_v4  ;;  %v55_v6 = vld [vmem:[#allocation5 + $0x50] sm:$0xff]  ;;  %v54_v7 = vld [vmem:[#allocation5 + $0x48] sm:$0xff]  ;;  %p291_p11 = scmp.lt.s32.totalorder %s165_s25, %s165_s25 }
  0x1f   :  { %200 = vmatprep.subr.mxu0 %v59_v1  ;;  %v53_v8 = vld [vmem:[#allocation5 + $0x40] sm:$0xff]  ;;  %v52_v9 = vld [vmem:[#allocation5 + $0x38] sm:$0xff]  ;;  %v51_v10 = vld [vmem:[#allocation5 + $0x30] sm:$0xff] }
  0x20   :  { %201 = vmatpush3.msra.mxu0 %v59_v1  ;;  %v50_v11 = vld [vmem:[#allocation5 + $0x28] sm:$0xff]  ;;  %v49_v12 = vld [vmem:[#allocation5 + $0x20] sm:$0xff]  ;;  %v48_v13 = vld [vmem:[#allocation5 + $0x18] sm:$0xff] }
  0x21   :  { %202 = vmatprep.subr.mxu0 %v58_v2  ;;  %v47_v14 = vld [vmem:[#allocation5 + $0x10] sm:$0xff]  ;;  %v46_v15 = vld [vmem:[#allocation5 + $0x8] sm:$0xff]  ;;  %v45_v16 = vld [vmem:[#allocation5] sm:$0xff] }
  0x22   :  { %203 = vmatpush3.msra.mxu0 %v58_v2  ;;  %v44_v17 = vld [vmem:[#allocation2 + $0x8] sm:$0xff]  ;;  %v177_v18 = vld [vmem:[%s360_s2] ss:$0 sm:$0xff]  ;;  %s286_s2 = scalar_lea.vmem %s165_s25, 256 }
  0x23   :  { %204 = vmatprep.subr.mxu0 %v57_v3  ;;  %p287_p10 = scmp.ne.s32.totalorder %s165_s25, %s286_s2  ;;  %p292_p12 = scmp.lt.s32.totalorder %s286_s2, %s286_s2 }
  0x24   :  { %205 = vmatpush3.msra.mxu0 %v57_v3 }
  0x25   :  { %206 = vmatprep.subr.mxu0 %v56_v5  ;;  %p293_p13 = por %p292_p12, %p291_p11 }
  0x26   :  { %207 = vmatpush3.msra.mxu0 %v56_v5 }
  0x27   :  { %208 = vmatprep.subr.mxu0 %v55_v6  ;;  %p294_p0 = pnand %p293_p13, %p287_p10 }
  0x28   :  { %209 = vmatpush3.msra.mxu0 %v55_v6 }
  0x29   :  { %210 = vmatprep.subr.mxu0 %v54_v7 }
  0x2a   :  { %211 = vmatpush3.msra.mxu0 %v54_v7 }
  0x2b   :  { %212 = vmatprep.subr.mxu0 %v53_v8 }
  0x2c   :  { %213 = vmatpush3.msra.mxu0 %v53_v8 }
  0x2d   :  { %214 = vmatprep.subr.mxu0 %v52_v9 }
  0x2e   :  { %215 = vmatpush3.msra.mxu0 %v52_v9 }
  0x2f   :  { %216 = vmatprep.subr.mxu0 %v51_v10 }
  0x30   :  { %217 = vmatpush3.msra.mxu0 %v51_v10 }
  0x31   :  { %218 = vmatprep.subr.mxu0 %v50_v11 }
  0x32   :  { %219 = vmatpush3.msra.mxu0 %v50_v11 }
  0x33   :  { %220 = vmatprep.subr.mxu0 %v49_v12 }
  0x34   :  { %221 = vmatpush3.msra.mxu0 %v49_v12 }
  0x35   :  { %222 = vmatprep.subr.mxu0 %v48_v13 }
  0x36   :  { %223 = vmatpush3.msra.mxu0 %v48_v13 }
  0x37   :  { %224 = vmatprep.subr.mxu0 %v47_v14 }
  0x38   :  { %225 = vmatpush3.msra.mxu0 %v47_v14 }
  0x39   :  { %226 = vmatprep.subr.mxu0 %v46_v15 }
  0x3a   :  { %227 = vmatpush3.msra.mxu0 %v46_v15 }
  0x3b   :  { %228 = vmatprep.subr.mxu0 %v45_v16 }
  0x3c   :  { %229 = vmatpush3.msra.mxu0 %v45_v16 }
  0x3d   :  { %231 = vmatmul.mubr.f32.vlgmr.msra.gmra.mxu0 %v44_v17 }
  0xfd   :  { %v232_v19 = vpop.f32.mrf.mxu0 }
  0xfe   :  { %v140_v20 = vadd.f32 %v232_v19, %v177_v18 }
  0xff   :  { %v134_v21 = vpop.f32.mrf.mxu0 }
 0x100   :  { %v179_v22 = vmul.f32 -1.442695, %v140_v20  ;;  %v135_v23 = vadd.f32 %v177_v18, %v134_v21 }
 0x102   :  { %238 = vpow2.f32 %v179_v22  ;;  %v178_v24 = vmul.f32 -1.442695, %v135_v23 }
 0x104   :  { %240 = vpow2.f32 %v178_v24 }
 0x10f   :  { %v239_v25 = vpop.eup %238 }
 0x110   :  { %v150_v26 = vadd.f32 1.0, %v239_v25 }
 0x111   :  { %v241_v27 = vpop.eup %240 }
 0x112   :  { %242 = vrcp.f32 %v150_v26  ;;  %v149_v28 = vadd.f32 1.0, %v241_v27 }
 0x114   :  { %244 = vrcp.f32 %v149_v28 }
 0x11f   :  { %v243_v29 = vpop.eup %242 }
 0x120   :  { %v156_v30 = vmul.f32 %v243_v29, %v140_v20 }
 0x121   :  { %v245_v31 = vpop.eup %244 }
 0x122   :  { %158 = vst [vmem:[#allocation7 + $0x8] sm:$0xff] %v156_v30  ;;  %v155_v32 = vmul.f32 %v245_v31, %v135_v23 }
 0x124   :  { %157 = vst [vmem:[#allocation7] sm:$0xff] %v155_v32 }
 0x125   :  { %297 = shalt.err (!%p294_p0)
}
 0x126   :  { %170 = dma.vmem_to_hbm [thread:$0]  %s165_s25, 256, %s361_s3, [#allocation4], %s313_s15, %s313_s15, %s314_s16  }
 0x127   :  { %310 = dma.done.wait [#allocation4], 256  }
 0x128   :  { %311 = vsyncadd [#allocation4], 4294967040 }
 0x129   :  { %174 = vsyncpa [#allocation3], 1 }
 0x12a   :  { %175 = vsyncpa [#allocation6], 1 }
 0x12b   :  { %176 = vsyncpa [#allocation4], 1 }

</bundles_post_ra>
